<compile_context>
chip_gen: v7x
topology: tpu7x:2x2x1
jax: 0.10.0
libtpu: 0.0.40
codegen_flags: <defaults>
</compile_context>

<pallas_src>
import jax
import jax.numpy as jnp
import numpy as np
from jax.experimental import pallas as pl
from jax.experimental.pallas import tpu as pltpu

HIDDEN_SIZE = 128    # module global hidden_size = 128
NUM_LAYERS = 2       # module global num_layers = 2
VOCAB = 32
SEQ_LEN = 8
BIDIRECTIONAL = False  # module global; bidirectional-sum branch never taken


def _gru_seq_kernel(tok_ref, emb_ref, h0_ref, wih_ref, whh_ref, bih_ref, bhh_ref,
                    out_ref, hid_ref):
    """One grid step == one timestep: embedding row + all GRU layers.

    tok_ref : SMEM int32 [T]           (scalar prefetch)
    emb_ref : VMEM bf16 [V, 1, H]      (resident)
    h0_ref  : VMEM f32  [L, 1, H]      (resident, initial hidden)
    wih_ref : VMEM bf16 [L, H, 3H]     (resident, Wih^T)
    whh_ref : VMEM bf16 [L, H, 3H]     (resident, Whh^T)
    bih_ref : VMEM f32  [L, 1, 3H]
    bhh_ref : VMEM f32  [L, 1, 3H]
    out_ref : VMEM f32  [1, 1, H]      (this step's top-layer output block)
    hid_ref : VMEM f32  [L, 1, H]      (resident output block == hidden carry)
    """
    t = pl.program_id(0)
    L = hid_ref.shape[0]
    H = hid_ref.shape[2]

    # Seed the resident hidden carry from the initial hidden on the first step.
    @pl.when(t == 0)
    def _():
        hid_ref[...] = h0_ref[...]

    # Hidden state at step entry (f32).
    h = [hid_ref[l] for l in range(L)]                                  # (1, H)

    # Hidden-only matmuls hoisted off the critical path: both depend only on the
    # state resident at step entry, so the MXU pushes issue back-to-back and
    # their fill/drain overlaps the layer-0 gate math below.
    gh = [
        jax.lax.dot_general(
            h[l].astype(jnp.bfloat16), whh_ref[l], (((1,), (0,)), ((), ())),
            preferred_element_type=jnp.float32) + bhh_ref[l]            # (1, 3H)
        for l in range(L)
    ]

    # Layer-0 input: embedding row for this step's token (table resident in VMEM).
    x = emb_ref[tok_ref[t]]                                             # (1, H) bf16

    h_new = h[0]
    for l in range(L):
        gi = jax.lax.dot_general(
            x, wih_ref[l], (((1,), (0,)), ((), ())),
            preferred_element_type=jnp.float32) + bih_ref[l]            # (1, 3H)
        r = jax.nn.sigmoid(gi[:, :H] + gh[l][:, :H])
        z = jax.nn.sigmoid(gi[:, H:2 * H] + gh[l][:, H:2 * H])
        n = jnp.tanh(gi[:, 2 * H:] + r * gh[l][:, 2 * H:])
        h_new = (1.0 - z) * n + z * h[l]                                # (1, H) f32
        hid_ref[l] = h_new
        x = h_new.astype(jnp.bfloat16)                                  # next layer input

    out_ref[0] = h_new            # GRU output == top layer's new hidden this step


def _run_gru(tokens, hidden, emb, wih, whh, bih, bhh):
    """tokens: int32 [T]; hidden: f32 [L,1,H]. Returns (outputs [T,1,H], hidden [L,1,H])."""
    T = tokens.shape[0]
    L, _, H = hidden.shape
    V = emb.shape[0]

    # Host-side layout prep (constant-folded once per weight set under jit).
    emb3 = emb.astype(jnp.bfloat16).reshape(V, 1, H)                    # (V,1,H)
    wih_t = jnp.swapaxes(wih, 1, 2).astype(jnp.bfloat16)                # (L,H,3H)
    whh_t = jnp.swapaxes(whh, 1, 2).astype(jnp.bfloat16)                # (L,H,3H)
    bih3 = bih.reshape(L, 1, 3 * H).astype(jnp.float32)                 # (L,1,3H)
    bhh3 = bhh.reshape(L, 1, 3 * H).astype(jnp.float32)                 # (L,1,3H)

    grid_spec = pltpu.PrefetchScalarGridSpec(
        num_scalar_prefetch=1,
        grid=(T,),
        in_specs=[
            # Constant index_map on every operand => DMA'd once, resident in VMEM
            # for the whole sequence.
            pl.BlockSpec((V, 1, H), lambda t, tok: (0, 0, 0)),          # embedding table
            pl.BlockSpec((L, 1, H), lambda t, tok: (0, 0, 0)),          # initial hidden
            pl.BlockSpec((L, H, 3 * H), lambda t, tok: (0, 0, 0)),      # Wih^T
            pl.BlockSpec((L, H, 3 * H), lambda t, tok: (0, 0, 0)),      # Whh^T
            pl.BlockSpec((L, 1, 3 * H), lambda t, tok: (0, 0, 0)),      # b_ih
            pl.BlockSpec((L, 1, 3 * H), lambda t, tok: (0, 0, 0)),      # b_hh
        ],
        out_specs=[
            pl.BlockSpec((1, 1, H), lambda t, tok: (t, 0, 0)),          # per-step output
            pl.BlockSpec((L, 1, H), lambda t, tok: (0, 0, 0)),          # hidden carry / final
        ],
    )

    outputs, hidden_new = pl.pallas_call(
        _gru_seq_kernel,
        out_shape=(jax.ShapeDtypeStruct((T, 1, H), jnp.float32),
                   jax.ShapeDtypeStruct((L, 1, H), jnp.float32)),
        grid_spec=grid_spec,
        compiler_params=pltpu.CompilerParams(
            dimension_semantics=("arbitrary",)),   # time recurrence => sequential
    )(tokens, emb3, hidden.astype(jnp.float32), wih_t, whh_t, bih3, bhh3)
    return outputs, hidden_new


def encoder_rnn_forward(token, hidden, emb, wih, whh, bih, bhh):
    """Matches the PyTorch module forward: one token -> (output [1,1,H], hidden [L,1,H])."""
    return _run_gru(token.reshape(1).astype(jnp.int32), hidden, emb, wih, whh, bih, bhh)


def encoder_rnn_forward_seq(tokens, hidden, emb, wih, whh, bih, bhh):
    """Equivalent to calling the module forward once per token, with weights kept resident."""
    return _run_gru(tokens.astype(jnp.int32), hidden, emb, wih, whh, bih, bhh)


def encoder_rnn_reference(tokens, hidden, emb, wih, whh, bih, bhh):
    """Pure-JAX f32 reference: module forward applied per token in a loop."""
    L, _, H = hidden.shape
    h = [hidden[l] for l in range(L)]
    outs = []
    for tok in np.asarray(tokens):
        x = emb[int(tok)][None, :]                       # embedded.view(1,1,-1) -> (1,H)
        for l in range(L):
            gi = x @ wih[l].T + bih[l]
            gh = h[l] @ whh[l].T + bhh[l]
            r = jax.nn.sigmoid(gi[:, :H] + gh[:, :H])
            z = jax.nn.sigmoid(gi[:, H:2 * H] + gh[:, H:2 * H])
            n = jnp.tanh(gi[:, 2 * H:] + r * gh[:, 2 * H:])
            h[l] = (1.0 - z) * n + z * h[l]
            x = h[l]
        outs.append(x)
    return jnp.stack(outs), jnp.stack(h)


if __name__ == "__main__":
    H, L, V, T = HIDDEN_SIZE, NUM_LAYERS, VOCAB, SEQ_LEN
    key = jax.random.PRNGKey(0)
    k_emb, k_wih, k_whh, k_bih, k_bhh, k_h, k_tok = jax.random.split(key, 7)
    scale = 1.0 / np.sqrt(H)

    emb = jax.random.normal(k_emb, (V, H), jnp.float32) * 0.1
    wih = jax.random.normal(k_wih, (L, 3 * H, H), jnp.float32) * scale
    whh = jax.random.normal(k_whh, (L, 3 * H, H), jnp.float32) * scale
    bih = jax.random.normal(k_bih, (L, 3 * H), jnp.float32) * scale
    bhh = jax.random.normal(k_bhh, (L, 3 * H), jnp.float32) * scale

    # hidden0 parameter is zeros(num_layers, 1, hidden); forward accepts an
    # arbitrary hidden, so use a random one for a stronger check.
    hidden = jax.random.normal(k_h, (L, 1, H), jnp.float32) * 0.1
    tokens = jax.random.randint(k_tok, (T,), 0, V, dtype=jnp.int32)

    # 1) Module-style single-token call (seq_len = 1).
    out1, h1 = encoder_rnn_forward(tokens[:1], hidden, emb, wih, whh, bih, bhh)
    out1 = jax.block_until_ready(out1)
    h1 = jax.block_until_ready(h1)
    out1_ref, h1_ref = encoder_rnn_reference(tokens[:1], hidden, emb, wih, whh, bih, bhh)
    assert out1.shape == (1, 1, H) and h1.shape == (L, 1, H)
    np.testing.assert_allclose(np.asarray(out1), np.asarray(out1_ref), rtol=2e-2, atol=2e-2)
    np.testing.assert_allclose(np.asarray(h1), np.asarray(h1_ref), rtol=2e-2, atol=2e-2)

    # 2) Sequence call: weights resident across all T timesteps (the big perf win).
    outs, hT = encoder_rnn_forward_seq(tokens, hidden, emb, wih, whh, bih, bhh)
    outs = jax.block_until_ready(outs)
    hT = jax.block_until_ready(hT)
    outs_ref, hT_ref = encoder_rnn_reference(tokens, hidden, emb, wih, whh, bih, bhh)
    assert outs.shape == (T, 1, H) and hT.shape == (L, 1, H)
    # bf16 weights + f32 accumulation vs pure-f32 reference -> loosened tolerance.
    np.testing.assert_allclose(np.asarray(outs), np.asarray(outs_ref), rtol=2e-2, atol=2e-2)
    np.testing.assert_allclose(np.asarray(hT), np.asarray(hT_ref), rtol=2e-2, atol=2e-2)

    print("KERNEL_OK")
</pallas_src>

<mosaic_0001>
module attributes {stable_mosaic.version = 11 : i64} {
  func.func @_gru_seq_kernel(%arg0: i32, %arg1: memref<1xi32, #tpu.memory_space<smem>>, %arg2: memref<32x1x128xbf16, #tpu.memory_space<vmem>>, %arg3: memref<2x1x128xf32, #tpu.memory_space<vmem>>, %arg4: memref<2x128x384xbf16, #tpu.memory_space<vmem>>, %arg5: memref<2x128x384xbf16, #tpu.memory_space<vmem>>, %arg6: memref<2x1x384xf32, #tpu.memory_space<vmem>>, %arg7: memref<2x1x384xf32, #tpu.memory_space<vmem>>, %arg8: memref<1x1x128xf32, #tpu.memory_space<vmem>>, %arg9: memref<2x1x128xf32, #tpu.memory_space<vmem>>) attributes {dimension_semantics = [#tpu.dimension_semantics<arbitrary>], iteration_bounds = array<i64: 1>, scalar_prefetch = 1 : i64, scratch_operands = 0 : i64, tpu.core_type = #tpu.core_type<tc>, window_params = [{pipeline_mode = #tpu.pipeline_mode<synchronous>, transform_indices = @transform_0, window_bounds = array<i64: 32, 1, 128>}, {pipeline_mode = #tpu.pipeline_mode<synchronous>, transform_indices = @transform_1, window_bounds = array<i64: 2, 1, 128>}, {pipeline_mode = #tpu.pipeline_mode<synchronous>, transform_indices = @transform_2, window_bounds = array<i64: 2, 128, 384>}, {pipeline_mode = #tpu.pipeline_mode<synchronous>, transform_indices = @transform_3, window_bounds = array<i64: 2, 128, 384>}, {pipeline_mode = #tpu.pipeline_mode<synchronous>, transform_indices = @transform_4, window_bounds = array<i64: 2, 1, 384>}, {pipeline_mode = #tpu.pipeline_mode<synchronous>, transform_indices = @transform_5, window_bounds = array<i64: 2, 1, 384>}, {transform_indices = @transform_6, window_bounds = array<i64: 1, 1, 128>}, {pipeline_mode = #tpu.pipeline_mode<synchronous>, transform_indices = @transform_7, window_bounds = array<i64: 2, 1, 128>}]} {
    %c0_i32 = arith.constant 0 : i32
    %0 = arith.cmpi eq, %arg0, %c0_i32 : i32
    %1 = arith.extui %0 : i1 to i32
    %c0_i32_0 = arith.constant 0 : i32
    %2 = arith.cmpi ne, %1, %c0_i32_0 : i32
    scf.if %2 {
      %c0_49 = arith.constant 0 : index
      %c0_50 = arith.constant 0 : index
      %c0_51 = arith.constant 0 : index
      %100 = vector.load %arg3[%c0_49, %c0_50, %c0_51] : memref<2x1x128xf32, #tpu.memory_space<vmem>>, vector<2x1x128xf32>
      %c0_52 = arith.constant 0 : index
      %c0_53 = arith.constant 0 : index
      %c0_54 = arith.constant 0 : index
      %101 = vector.load %arg9[%c0_52, %c0_53, %c0_54] : memref<2x1x128xf32, #tpu.memory_space<vmem>>, vector<2x1x128xf32>
      tpu.vector_store %arg9[%c0_52, %c0_53, %c0_54], %100 {strides = array<i32>} : memref<2x1x128xf32, #tpu.memory_space<vmem>>, vector<2x1x128xf32>,
    } else {
    }
    %c0 = arith.constant 0 : index
    %c0_1 = arith.constant 0 : index
    %c0_2 = arith.constant 0 : index
    %3 = vector.load %arg9[%c0, %c0_1, %c0_2] : memref<2x1x128xf32, #tpu.memory_space<vmem>>, vector<1x1x128xf32>
    %4 = vector.shape_cast %3 : vector<1x1x128xf32> to vector<1x128xf32>
    %c1 = arith.constant 1 : index
    %c0_3 = arith.constant 0 : index
    %c0_4 = arith.constant 0 : index
    %5 = vector.load %arg9[%c1, %c0_3, %c0_4] : memref<2x1x128xf32, #tpu.memory_space<vmem>>, vector<1x1x128xf32>
    %6 = vector.shape_cast %5 : vector<1x1x128xf32> to vector<1x128xf32>
    %7 = arith.truncf %4 : vector<1x128xf32> to vector<1x128xbf16>
    %c0_5 = arith.constant 0 : index
    %c0_6 = arith.constant 0 : index
    %c0_7 = arith.constant 0 : index
    %8 = vector.load %arg5[%c0_5, %c0_6, %c0_7] : memref<2x128x384xbf16, #tpu.memory_space<vmem>>, vector<1x128x384xbf16>
    %9 = vector.shape_cast %8 : vector<1x128x384xbf16> to vector<128x384xbf16>
    %cst = arith.constant dense<0.000000e+00> : vector<1x384xf32>
    %10 = tpu.matmul %7, %9, %cst {dimension_numbers = #tpu.dot_dimension_numbers<[1], [0], [0], [1], [0, 0, 1, 1], [], []>} : vector<1x128xbf16>, vector<128x384xbf16>, vector<1x384xf32> -> vector<1x384xf32>
    %c0_8 = arith.constant 0 : index
    %c0_9 = arith.constant 0 : index
    %c0_10 = arith.constant 0 : index
    %11 = vector.load %arg7[%c0_8, %c0_9, %c0_10] : memref<2x1x384xf32, #tpu.memory_space<vmem>>, vector<1x1x384xf32>
    %12 = vector.shape_cast %11 : vector<1x1x384xf32> to vector<1x384xf32>
    %13 = arith.addf %10, %12 : vector<1x384xf32>
    %14 = arith.truncf %6 : vector<1x128xf32> to vector<1x128xbf16>
    %c1_11 = arith.constant 1 : index
    %c0_12 = arith.constant 0 : index
    %c0_13 = arith.constant 0 : index
    %15 = vector.load %arg5[%c1_11, %c0_12, %c0_13] : memref<2x128x384xbf16, #tpu.memory_space<vmem>>, vector<1x128x384xbf16>
    %16 = vector.shape_cast %15 : vector<1x128x384xbf16> to vector<128x384xbf16>
    %cst_14 = arith.constant dense<0.000000e+00> : vector<1x384xf32>
    %17 = tpu.matmul %14, %16, %cst_14 {dimension_numbers = #tpu.dot_dimension_numbers<[1], [0], [0], [1], [0, 0, 1, 1], [], []>} : vector<1x128xbf16>, vector<128x384xbf16>, vector<1x384xf32> -> vector<1x384xf32>
    %c1_15 = arith.constant 1 : index
    %c0_16 = arith.constant 0 : index
    %c0_17 = arith.constant 0 : index
    %18 = vector.load %arg7[%c1_15, %c0_16, %c0_17] : memref<2x1x384xf32, #tpu.memory_space<vmem>>, vector<1x1x384xf32>
    %19 = vector.shape_cast %18 : vector<1x1x384xf32> to vector<1x384xf32>
    %20 = arith.addf %17, %19 : vector<1x384xf32>
    %21 = arith.index_cast %arg0 : i32 to index
    %22 = memref.load %arg1[%21] : memref<1xi32, #tpu.memory_space<smem>>
    %23 = arith.index_cast %22 : i32 to index
    %c0_18 = arith.constant 0 : index
    %c0_19 = arith.constant 0 : index
    %24 = vector.load %arg2[%23, %c0_18, %c0_19] : memref<32x1x128xbf16, #tpu.memory_space<vmem>>, vector<1x1x128xbf16>
    %25 = vector.shape_cast %24 : vector<1x1x128xbf16> to vector<1x128xbf16>
    %c0_20 = arith.constant 0 : index
    %c0_21 = arith.constant 0 : index
    %c0_22 = arith.constant 0 : index
    %26 = vector.load %arg4[%c0_20, %c0_21, %c0_22] : memref<2x128x384xbf16, #tpu.memory_space<vmem>>, vector<1x128x384xbf16>
    %27 = vector.shape_cast %26 : vector<1x128x384xbf16> to vector<128x384xbf16>
    %cst_23 = arith.constant dense<0.000000e+00> : vector<1x384xf32>
    %28 = tpu.matmul %25, %27, %cst_23 {dimension_numbers = #tpu.dot_dimension_numbers<[1], [0], [0], [1], [0, 0, 1, 1], [], []>} : vector<1x128xbf16>, vector<128x384xbf16>, vector<1x384xf32> -> vector<1x384xf32>
    %c0_24 = arith.constant 0 : index
    %c0_25 = arith.constant 0 : index
    %c0_26 = arith.constant 0 : index
    %29 = vector.load %arg6[%c0_24, %c0_25, %c0_26] : memref<2x1x384xf32, #tpu.memory_space<vmem>>, vector<1x1x384xf32>
    %30 = vector.shape_cast %29 : vector<1x1x384xf32> to vector<1x384xf32>
    %31 = arith.addf %28, %30 : vector<1x384xf32>
    %32 = vector.extract_strided_slice %31 {offsets = [0, 0], sizes = [1, 128], strides = [1, 1]} : vector<1x384xf32> to vector<1x128xf32>
    %33 = vector.extract_strided_slice %13 {offsets = [0, 0], sizes = [1, 128], strides = [1, 1]} : vector<1x384xf32> to vector<1x128xf32>
    %34 = arith.addf %32, %33 : vector<1x128xf32>
    %35 = arith.negf %34 : vector<1x128xf32>
    %36 = math.exp %35 : vector<1x128xf32>
    %cst_27 = arith.constant 1.000000e+00 : f32
    %37 = vector.broadcast %cst_27 : f32 to vector<1x128xf32>
    %38 = arith.addf %37, %36 : vector<1x128xf32>
    %39 = arith.divf %37, %38 : vector<1x128xf32>
    %40 = vector.extract_strided_slice %31 {offsets = [0, 128], sizes = [1, 128], strides = [1, 1]} : vector<1x384xf32> to vector<1x128xf32>
    %41 = vector.extract_strided_slice %13 {offsets = [0, 128], sizes = [1, 128], strides = [1, 1]} : vector<1x384xf32> to vector<1x128xf32>
    %42 = arith.addf %40, %41 : vector<1x128xf32>
    %43 = arith.negf %42 : vector<1x128xf32>
    %44 = math.exp %43 : vector<1x128xf32>
    %cst_28 = arith.constant 1.000000e+00 : f32
    %45 = vector.broadcast %cst_28 : f32 to vector<1x128xf32>
    %46 = arith.addf %45, %44 : vector<1x128xf32>
    %47 = arith.divf %45, %46 : vector<1x128xf32>
    %48 = vector.extract_strided_slice %31 {offsets = [0, 256], sizes = [1, 128], strides = [1, 1]} : vector<1x384xf32> to vector<1x128xf32>
    %49 = vector.extract_strided_slice %13 {offsets = [0, 256], sizes = [1, 128], strides = [1, 1]} : vector<1x384xf32> to vector<1x128xf32>
    %50 = arith.mulf %39, %49 : vector<1x128xf32>
    %51 = arith.addf %48, %50 : vector<1x128xf32>
    %52 = math.tanh %51 : vector<1x128xf32>
    %cst_29 = arith.constant 1.000000e+00 : f32
    %53 = vector.broadcast %cst_29 : f32 to vector<1x128xf32>
    %54 = arith.subf %53, %47 : vector<1x128xf32>
    %55 = arith.mulf %54, %52 : vector<1x128xf32>
    %56 = arith.mulf %47, %4 : vector<1x128xf32>
    %57 = arith.addf %55, %56 : vector<1x128xf32>
    %c0_30 = arith.constant 0 : index
    %c0_31 = arith.constant 0 : index
    %c0_32 = arith.constant 0 : index
    %58 = vector.load %arg9[%c0_30, %c0_31, %c0_32] : memref<2x1x128xf32, #tpu.memory_space<vmem>>, vector<1x1x128xf32>
    %59 = vector.shape_cast %58 : vector<1x1x128xf32> to vector<1x128xf32>
    %60 = vector.shape_cast %57 : vector<1x128xf32> to vector<1x1x128xf32>
    tpu.vector_store %arg9[%c0_30, %c0_31, %c0_32], %60 {strides = array<i32>} : memref<2x1x128xf32, #tpu.memory_space<vmem>>, vector<1x1x128xf32>,
    %61 = arith.truncf %57 : vector<1x128xf32> to vector<1x128xbf16>
    %c1_33 = arith.constant 1 : index
    %c0_34 = arith.constant 0 : index
    %c0_35 = arith.constant 0 : index
    %62 = vector.load %arg4[%c1_33, %c0_34, %c0_35] : memref<2x128x384xbf16, #tpu.memory_space<vmem>>, vector<1x128x384xbf16>
    %63 = vector.shape_cast %62 : vector<1x128x384xbf16> to vector<128x384xbf16>
    %cst_36 = arith.constant dense<0.000000e+00> : vector<1x384xf32>
    %64 = tpu.matmul %61, %63, %cst_36 {dimension_numbers = #tpu.dot_dimension_numbers<[1], [0], [0], [1], [0, 0, 1, 1], [], []>} : vector<1x128xbf16>, vector<128x384xbf16>, vector<1x384xf32> -> vector<1x384xf32>
    %c1_37 = arith.constant 1 : index
    %c0_38 = arith.constant 0 : index
    %c0_39 = arith.constant 0 : index
    %65 = vector.load %arg6[%c1_37, %c0_38, %c0_39] : memref<2x1x384xf32, #tpu.memory_space<vmem>>, vector<1x1x384xf32>
    %66 = vector.shape_cast %65 : vector<1x1x384xf32> to vector<1x384xf32>
    %67 = arith.addf %64, %66 : vector<1x384xf32>
    %68 = vector.extract_strided_slice %67 {offsets = [0, 0], sizes = [1, 128], strides = [1, 1]} : vector<1x384xf32> to vector<1x128xf32>
    %69 = vector.extract_strided_slice %20 {offsets = [0, 0], sizes = [1, 128], strides = [1, 1]} : vector<1x384xf32> to vector<1x128xf32>
    %70 = arith.addf %68, %69 : vector<1x128xf32>
    %71 = arith.negf %70 : vector<1x128xf32>
    %72 = math.exp %71 : vector<1x128xf32>
    %cst_40 = arith.constant 1.000000e+00 : f32
    %73 = vector.broadcast %cst_40 : f32 to vector<1x128xf32>
    %74 = arith.addf %73, %72 : vector<1x128xf32>
    %75 = arith.divf %73, %74 : vector<1x128xf32>
    %76 = vector.extract_strided_slice %67 {offsets = [0, 128], sizes = [1, 128], strides = [1, 1]} : vector<1x384xf32> to vector<1x128xf32>
    %77 = vector.extract_strided_slice %20 {offsets = [0, 128], sizes = [1, 128], strides = [1, 1]} : vector<1x384xf32> to vector<1x128xf32>
    %78 = arith.addf %76, %77 : vector<1x128xf32>
    %79 = arith.negf %78 : vector<1x128xf32>
    %80 = math.exp %79 : vector<1x128xf32>
    %cst_41 = arith.constant 1.000000e+00 : f32
    %81 = vector.broadcast %cst_41 : f32 to vector<1x128xf32>
    %82 = arith.addf %81, %80 : vector<1x128xf32>
    %83 = arith.divf %81, %82 : vector<1x128xf32>
    %84 = vector.extract_strided_slice %67 {offsets = [0, 256], sizes = [1, 128], strides = [1, 1]} : vector<1x384xf32> to vector<1x128xf32>
    %85 = vector.extract_strided_slice %20 {offsets = [0, 256], sizes = [1, 128], strides = [1, 1]} : vector<1x384xf32> to vector<1x128xf32>
    %86 = arith.mulf %75, %85 : vector<1x128xf32>
    %87 = arith.addf %84, %86 : vector<1x128xf32>
    %88 = math.tanh %87 : vector<1x128xf32>
    %cst_42 = arith.constant 1.000000e+00 : f32
    %89 = vector.broadcast %cst_42 : f32 to vector<1x128xf32>
    %90 = arith.subf %89, %83 : vector<1x128xf32>
    %91 = arith.mulf %90, %88 : vector<1x128xf32>
    %92 = arith.mulf %83, %6 : vector<1x128xf32>
    %93 = arith.addf %91, %92 : vector<1x128xf32>
    %c1_43 = arith.constant 1 : index
    %c0_44 = arith.constant 0 : index
    %c0_45 = arith.constant 0 : index
    %94 = vector.load %arg9[%c1_43, %c0_44, %c0_45] : memref<2x1x128xf32, #tpu.memory_space<vmem>>, vector<1x1x128xf32>
    %95 = vector.shape_cast %94 : vector<1x1x128xf32> to vector<1x128xf32>
    %96 = vector.shape_cast %93 : vector<1x128xf32> to vector<1x1x128xf32>
    tpu.vector_store %arg9[%c1_43, %c0_44, %c0_45], %96 {strides = array<i32>} : memref<2x1x128xf32, #tpu.memory_space<vmem>>, vector<1x1x128xf32>,
    %c0_46 = arith.constant 0 : index
    %c0_47 = arith.constant 0 : index
    %c0_48 = arith.constant 0 : index
    %97 = vector.load %arg8[%c0_46, %c0_47, %c0_48] : memref<1x1x128xf32, #tpu.memory_space<vmem>>, vector<1x1x128xf32>
    %98 = vector.shape_cast %97 : vector<1x1x128xf32> to vector<1x128xf32>
    %99 = vector.shape_cast %93 : vector<1x128xf32> to vector<1x1x128xf32>
    tpu.vector_store %arg8[%c0_46, %c0_47, %c0_48], %99 {strides = array<i32>} : memref<1x1x128xf32, #tpu.memory_space<vmem>>, vector<1x1x128xf32>,
    return
  }
  func.func @transform_0(%arg0: i32, %arg1: memref<1xi32, #tpu.memory_space<smem>>) -> (i32, i32, i32) {
    %c0_i32 = arith.constant 0 : i32
    %c0_i32_0 = arith.constant 0 : i32
    %c0_i32_1 = arith.constant 0 : i32
    %c0_i32_2 = arith.constant 0 : i32
    return %c0_i32, %c0_i32_0, %c0_i32_1 : i32, i32, i32
  }
  func.func @transform_1(%arg0: i32, %arg1: memref<1xi32, #tpu.memory_space<smem>>) -> (i32, i32, i32) {
    %c0_i32 = arith.constant 0 : i32
    %c0_i32_0 = arith.constant 0 : i32
    %c0_i32_1 = arith.constant 0 : i32
    %c0_i32_2 = arith.constant 0 : i32
    return %c0_i32, %c0_i32_0, %c0_i32_1 : i32, i32, i32
  }
  func.func @transform_2(%arg0: i32, %arg1: memref<1xi32, #tpu.memory_space<smem>>) -> (i32, i32, i32) {
    %c0_i32 = arith.constant 0 : i32
    %c0_i32_0 = arith.constant 0 : i32
    %c0_i32_1 = arith.constant 0 : i32
    %c0_i32_2 = arith.constant 0 : i32
    return %c0_i32, %c0_i32_0, %c0_i32_1 : i32, i32, i32
  }
  func.func @transform_3(%arg0: i32, %arg1: memref<1xi32, #tpu.memory_space<smem>>) -> (i32, i32, i32) {
    %c0_i32 = arith.constant 0 : i32
    %c0_i32_0 = arith.constant 0 : i32
    %c0_i32_1 = arith.constant 0 : i32
    %c0_i32_2 = arith.constant 0 : i32
    return %c0_i32, %c0_i32_0, %c0_i32_1 : i32, i32, i32
  }
  func.func @transform_4(%arg0: i32, %arg1: memref<1xi32, #tpu.memory_space<smem>>) -> (i32, i32, i32) {
    %c0_i32 = arith.constant 0 : i32
    %c0_i32_0 = arith.constant 0 : i32
    %c0_i32_1 = arith.constant 0 : i32
    %c0_i32_2 = arith.constant 0 : i32
    return %c0_i32, %c0_i32_0, %c0_i32_1 : i32, i32, i32
  }
  func.func @transform_5(%arg0: i32, %arg1: memref<1xi32, #tpu.memory_space<smem>>) -> (i32, i32, i32) {
    %c0_i32 = arith.constant 0 : i32
    %c0_i32_0 = arith.constant 0 : i32
    %c0_i32_1 = arith.constant 0 : i32
    %c0_i32_2 = arith.constant 0 : i32
    return %c0_i32, %c0_i32_0, %c0_i32_1 : i32, i32, i32
  }
  func.func @transform_6(%arg0: i32, %arg1: memref<1xi32, #tpu.memory_space<smem>>) -> (i32, i32, i32) {
    %c0_i32 = arith.constant 0 : i32
    %c0_i32_0 = arith.constant 0 : i32
    %c0_i32_1 = arith.constant 0 : i32
    return %arg0, %c0_i32, %c0_i32_0 : i32, i32, i32
  }
  func.func @transform_7(%arg0: i32, %arg1: memref<1xi32, #tpu.memory_space<smem>>) -> (i32, i32, i32) {
    %c0_i32 = arith.constant 0 : i32
    %c0_i32_0 = arith.constant 0 : i32
    %c0_i32_1 = arith.constant 0 : i32
    %c0_i32_2 = arith.constant 0 : i32
    return %c0_i32, %c0_i32_0, %c0_i32_1 : i32, i32, i32
  }
}

</mosaic_0001>

<bundles_post_ra>
// kernel: tpu_custom_call.1
= control target key start
LH: loop header
LB: loop body
LE: loop exit
PB: predicated region body
PF: predicated region fallthrough
CT: control target
= control target key end

     0   :  { %15 = vsyncpa [#allocation5], 0  ;;  %s1867_s0 = inlined_call_operand.<no memory space> [shape: s32[1], index: 0, kind: input, shape index: {}]   ;;  %s1868_s1 = inlined_call_operand.vmem [shape: bf16[32,1,128], index: 1, kind: input, shape index: {}]   ;;  %s1869_s2 = inlined_call_operand.vmem [shape: f32[2,1,128], index: 2, kind: input, shape index: {}]   ;;  %s1870_s3 = inlined_call_operand.hbm [shape: bf16[2,128,384], index: 3, kind: input, shape index: {}]   ;;  %s1871_s4 = inlined_call_operand.hbm [shape: bf16[2,128,384], index: 4, kind: input, shape index: {}]   ;;  %s1872_s5 = inlined_call_operand.vmem [shape: f32[2,1,384], index: 5, kind: input, shape index: {}]   ;;  %s1873_s6 = inlined_call_operand.vmem [shape: f32[2,1,384], index: 6, kind: input, shape index: {}]   ;;  %s1874_s7 = inlined_call_operand.hbm [shape: f32[1,1,128], index: 7, kind: output, shape index: {0}]   ;;  %s1875_s8 = inlined_call_operand.hbm [shape: f32[2,1,128], index: 8, kind: output, shape index: {1}]  }
   0x1   :  { %16 = vsyncpa [#allocation8], 0 }
   0x2   :  { %17 = vsyncpa [#allocation6], 0 }
   0x3   :  { %18 = vsyncpa [#allocation11], 0  ;;  %s1678_s27 = smov [#allocation4]   ;;  %s1582_s9 = scalar_lea.hbm %s1870_s3, 6144 }
   0x4   :  { %s28_s28 = sshll.u32 %s1678_s27, 4  ;;  %p1583_p0 = scmp.ne.s32.totalorder %s1870_s3, %s1582_s9  ;;  %s29_s28 = int_to_ptr.vmem [resolvable:$true] %s28_s28 }
   0x5   :  { %p1586_p1 = scmp.lt.u32.totalorder %s1582_s9, %s1870_s3 }
   0x7   :  { %p1588_p2 = pnand %p1586_p1, %p1583_p0 }
   0x9   :  { %1591 = shalt.err (!%p1588_p2)
}
   0xa   :  { %s1592_s14 = scalar_lea.vmem %s29_s28, 6144  ;;  %p1597_p4 = scmp.lt.s32.totalorder %s29_s28, %s29_s28 }
   0xb   :  { %p1593_p3 = scmp.ne.s32.totalorder %s29_s28, %s1592_s14  ;;  %p1598_p5 = scmp.lt.s32.totalorder %s1592_s14, %s1592_s14 }
   0xd   :  { %p1599_p6 = por %p1598_p5, %p1597_p4 }
   0xf   :  { %p1600_p7 = pnand %p1599_p6, %p1593_p3 }
  0x11   :  { %1603 = shalt.err (!%p1600_p7)
}
  0x12   :  { %s1679_s15 = smov 192   ;;  %s1680_s16 = smov 12  }
  0x13   :  { %34 = dma.hbm_to_vmem [thread:$0]  %s1870_s3, 6144, %s29_s28, [#allocation5], %s1679_s15, %s1679_s15, %s1680_s16  }
  0x14   :  { %s1681_s19 = smov [#allocation7]   ;;  %s1604_s23 = scalar_lea.hbm %s1871_s4, 6144 }
  0x15   :  { %s40_s20 = sshll.u32 %s1681_s19, 4  ;;  %p1605_p8 = scmp.ne.s32.totalorder %s1871_s4, %s1604_s23  ;;  %s41_s20 = int_to_ptr.vmem [resolvable:$true] %s40_s20 }
  0x16   :  { %p1608_p9 = scmp.lt.u32.totalorder %s1604_s23, %s1871_s4 }
  0x18   :  { %p1610_p10 = pnand %p1608_p9, %p1605_p8 }
  0x1a   :  { %1613 = shalt.err (!%p1610_p10)
}
  0x1b   :  { %s1614_s29 = scalar_lea.vmem %s41_s20, 6144  ;;  %p1619_p12 = scmp.lt.s32.totalorder %s41_s20, %s41_s20 }
  0x1c   :  { %p1615_p11 = scmp.ne.s32.totalorder %s41_s20, %s1614_s29  ;;  %p1620_p13 = scmp.lt.s32.totalorder %s1614_s29, %s1614_s29 }
  0x1e   :  { %p1621_p0 = por %p1620_p13, %p1619_p12 }
  0x20   :  { %p1622_p1 = pnand %p1621_p0, %p1615_p11 }
  0x22   :  { %1625 = shalt.err (!%p1622_p1)
}
  0x23   :  { %46 = dma.hbm_to_vmem [thread:$0]  %s1871_s4, 6144, %s41_s20, [#allocation8], %s1679_s15, %s1679_s15, %s1680_s16  }
  0x24   :  { %1670 = dma.done.wait [#allocation5], 6144  }
  0x25   :  { %1671 = vsyncadd [#allocation5], 4294961152 }
  0x26   :  { %1672 = dma.done.wait [#allocation8], 6144  }
  0x27   :  { %1673 = vsyncadd [#allocation8], 4294961152  ;;  %v1682_v0 = vmov 0.0   ;;  %v1683_v1 = vmov 0   ;;  %vm1684_vm0 = vmmov 0   ;;  %s590_s12 = scalar_lea.vmem %s1868_s1, %s1867_s0  ;;  %s1686_s19 = smov [#allocation10]  }
  0x28   :  { %1327 = vmatprep.subr.bf16.mxu1 %v1682_v0  ;;  %279 = vmatprep.mubr.bf16.mxu0 %v1683_v1  ;;  %v1434_v2 = vld [vmem:[#allocation7 + $0x4] ss:$12 sps:$4 sm:$0xff]   ;;  %v1436_v3 = vld [vmem:[#allocation7] ss:$12 sps:$4 sm:$0xff]   ;;  %v1437_v4 = vld [vmem:[#allocation7 + $0x1c] ss:$12 sps:$4 sm:$0xff]  }
  0x29   :  { %1343 = vmatprep.mubr.msk.bf16.mxu1 %vm1684_vm0, %v1682_v0  ;;  %247 = vmatprep.subr.bf16.mxu0 %v1434_v2  ;;  %v1439_v5 = vld [vmem:[#allocation7 + $0x18] ss:$12 sps:$4 sm:$0xff]   ;;  %v1440_v6 = vld [vmem:[#allocation7 + $0x34] ss:$12 sps:$4 sm:$0xff]   ;;  %v1442_v7 = vld [vmem:[#allocation7 + $0x30] ss:$12 sps:$4 sm:$0xff]  }
  0x2a   :  { %248 = vmatpush1.bf16.msra.mxu0 %v1436_v3  ;;  %v1443_v8 = vld [vmem:[#allocation7 + $0x4c] ss:$12 sps:$4 sm:$0xff]   ;;  %v1455_v9 = vld [vmem:[#allocation7 + $0x8] ss:$12 sps:$4 sm:$0xff]   ;;  %v1446_v11 = vld [vmem:[#allocation7 + $0x64] ss:$12 sps:$4 sm:$0xff]  }
  0x2b   :  { %249 = vmatprep.subr.bf16.mxu0 %v1437_v4  ;;  %v1445_v10 = vld [vmem:[#allocation7 + $0x48] ss:$12 sps:$4 sm:$0xff]   ;;  %1328 = vmatpush3.bf16.msra.mxu1 %v1455_v9  ;;  %v1459_v12 = vld [vmem:[#allocation7 + $0x20] ss:$12 sps:$4 sm:$0xff]   ;;  %v1463_v16 = vld [vmem:[#allocation7 + $0x38] ss:$12 sps:$4 sm:$0xff]  }
  0x2c   :  { %1329 = vmatprep.subr.bf16.mxu1 %v1682_v0  ;;  %v62_v13 = vld [vmem:[%s1869_s2] sm:$0x3]   ;;  %v1449_v15 = vld [vmem:[#allocation7 + $0x7c] ss:$12 sps:$4 sm:$0xff]   ;;  %v1451_v17 = vld [vmem:[#allocation7 + $0x78] ss:$12 sps:$4 sm:$0xff]  }
  0x2d   :  { %v1448_v14 = vld [vmem:[#allocation7 + $0x60] ss:$12 sps:$4 sm:$0xff]   ;;  %64 = vst [vmem:[#allocation10] sm:$0x3] %v62_v13   ;;  %v1467_v19 = vld [vmem:[#allocation7 + $0x50] ss:$12 sps:$4 sm:$0xff]  }
  0x2e   :  { %250 = vmatpush1.bf16.msra.mxu0 %v1439_v5  ;;  %v1452_v18 = vld [vmem:[#allocation7 + $0x94] ss:$12 sps:$4 sm:$0xff]   ;;  %v1454_v20 = vld [vmem:[#allocation7 + $0x90] ss:$12 sps:$4 sm:$0xff]   ;;  %v1456_v21 = vld [vmem:[#allocation7 + $0xac] ss:$12 sps:$4 sm:$0xff]  }
  0x2f   :  { %251 = vmatprep.subr.bf16.mxu0 %v1440_v6  ;;  %1330 = vmatpush3.bf16.msra.mxu1 %v1459_v12  ;;  %v1471_v22 = vld [vmem:[#allocation7 + $0x68] ss:$12 sps:$4 sm:$0xff]   ;;  %v1462_v25 = vld [vmem:[#allocation7 + $0xc4] ss:$12 sps:$4 sm:$0xff]   ;;  %v1475_v26 = vld [vmem:[#allocation7 + $0x80] ss:$12 sps:$4 sm:$0xff]  }
  0x30   :  { %1331 = vmatprep.subr.bf16.mxu1 %v1682_v0  ;;  %v1458_v23 = vld [vmem:[#allocation7 + $0xa8] ss:$12 sps:$4 sm:$0xff]   ;;  %v1460_v27 = vld [vmem:[#allocation7 + $0xc0] ss:$12 sps:$4 sm:$0xff]   ;;  %v1479_v30 = vld [vmem:[#allocation7 + $0x98] ss:$12 sps:$4 sm:$0xff]  }
  0x31   :  { %v1466_v29 = vld [vmem:[#allocation7 + $0xdc] ss:$12 sps:$4 sm:$0xff]   ;;  %v1464_v31 = vld [vmem:[#allocation7 + $0xd8] ss:$12 sps:$4 sm:$0xff]   ;;  %v1470_v32 = vld [vmem:[#allocation7 + $0xf4] ss:$12 sps:$4 sm:$0xff]  }
  0x32   :  { %252 = vmatpush1.bf16.msra.mxu0 %v1442_v7  ;;  %v1483_v33 = vld [vmem:[#allocation7 + $0xb0] ss:$12 sps:$4 sm:$0xff]   ;;  %v1474_v35 = vld [vmem:[#allocation7 + $0x10c] ss:$12 sps:$4 sm:$0xff]   ;;  %v1487_v36 = vld [vmem:[#allocation7 + $0xc8] ss:$12 sps:$4 sm:$0xff]  }
  0x33   :  { %253 = vmatprep.subr.bf16.mxu0 %v1443_v8  ;;  %1332 = vmatpush3.bf16.msra.mxu1 %v1463_v16  ;;  %v1468_v34 = vld [vmem:[#allocation7 + $0xf0] ss:$12 sps:$4 sm:$0xff]   ;;  %v1472_v37 = vld [vmem:[#allocation7 + $0x108] ss:$12 sps:$4 sm:$0xff]   ;;  %v1491_v39 = vld [vmem:[#allocation7 + $0xe0] ss:$12 sps:$4 sm:$0xff]  }
  0x34   :  { %1333 = vmatprep.subr.bf16.mxu1 %v1682_v0  ;;  %v1769_v24 = vld [vmem:[#allocation10] sm:$0x1]  ;;  %v1478_v38 = vld [vmem:[#allocation7 + $0x124] ss:$12 sps:$4 sm:$0xff]   ;;  %v1482_v41 = vld [vmem:[#allocation7 + $0x13c] ss:$12 sps:$4 sm:$0xff]  }
  0x35   :  { %v69_v28 = vpack.c.bf16 %v1769_v24, %v1769_v24  ;;  %v1476_v40 = vld [vmem:[#allocation7 + $0x120] ss:$12 sps:$4 sm:$0xff]   ;;  %v1495_v42 = vld [vmem:[#allocation7 + $0xf8] ss:$12 sps:$4 sm:$0xff]   ;;  %v1499_v45 = vld [vmem:[#allocation7 + $0x110] ss:$12 sps:$4 sm:$0xff]  }
  0x36   :  { %254 = vmatpush1.bf16.msra.mxu0 %v1445_v10  ;;  %v1480_v43 = vld [vmem:[#allocation7 + $0x138] ss:$12 sps:$4 sm:$0xff]   ;;  %v1486_v44 = vld [vmem:[#allocation7 + $0x154] ss:$12 sps:$4 sm:$0xff]   ;;  %v1484_v46 = vld [vmem:[#allocation7 + $0x150] ss:$12 sps:$4 sm:$0xff]  }
  0x37   :  { %255 = vmatprep.subr.bf16.mxu0 %v1446_v11  ;;  %1334 = vmatpush3.bf16.msra.mxu1 %v1467_v19  ;;  %v1490_v47 = vld [vmem:[#allocation7 + $0x16c] ss:$12 sps:$4 sm:$0xff]   ;;  %v1503_v48 = vld [vmem:[#allocation7 + $0x128] ss:$12 sps:$4 sm:$0xff]   ;;  %v1783_v50 = vld [vmem:[#allocation10 + $0x1] sm:$0x1] }
  0x38   :  { %1335 = vmatprep.subr.bf16.mxu1 %v1682_v0  ;;  %v1488_v49 = vld [vmem:[#allocation7 + $0x168] ss:$12 sps:$4 sm:$0xff]   ;;  %v1494_v51 = vld [vmem:[#allocation4 + $0x4] ss:$12 sps:$4 sm:$0xff]   ;;  %v1507_v52 = vld [vmem:[#allocation7 + $0x140] ss:$12 sps:$4 sm:$0xff]   ;;  %v328_v54 = vpack.c.bf16 %v1783_v50, %v1783_v50 }
  0x39   :  { %v1492_v53 = vld [vmem:[#allocation4] ss:$12 sps:$4 sm:$0xff]   ;;  %v1498_v55 = vld [vmem:[#allocation4 + $0x1c] ss:$12 sps:$4 sm:$0xff]   ;;  %v1511_v56 = vld [vmem:[#allocation7 + $0x158] ss:$12 sps:$4 sm:$0xff]  }
  0x3a   :  { %256 = vmatpush1.bf16.msra.mxu0 %v1448_v14  ;;  %v1496_v57 = vld [vmem:[#allocation4 + $0x18] ss:$12 sps:$4 sm:$0xff]   ;;  %v1502_v58 = vld [vmem:[#allocation4 + $0x34] ss:$12 sps:$4 sm:$0xff]   ;;  %v1515_v59 = vld [vmem:[#allocation7 + $0x170] ss:$12 sps:$4 sm:$0xff]  }
  0x3b   :  { %257 = vmatprep.subr.bf16.mxu0 %v1449_v15  ;;  %1336 = vmatpush3.bf16.msra.mxu1 %v1471_v22  ;;  %v1500_v60 = vld [vmem:[#allocation4 + $0x30] ss:$12 sps:$4 sm:$0xff]   ;;  %v1506_v61 = vld [vmem:[#allocation4 + $0x4c] ss:$12 sps:$4 sm:$0xff]   ;;  %v1519_v62 = vld [vmem:[#allocation4 + $0x8] ss:$12 sps:$4 sm:$0xff]  }
  0x3c   :  { %1337 = vmatprep.subr.bf16.mxu1 %v1682_v0  ;;  %v1504_v63 = vld [vmem:[#allocation4 + $0x48] ss:$12 sps:$4 sm:$0xff]   ;;  %v1510_v2 = vld [vmem:[#allocation4 + $0x64] ss:$12 sps:$4 sm:$0xff]   ;;  %v1523_v3 = vld [vmem:[#allocation4 + $0x20] ss:$12 sps:$4 sm:$0xff]  }
  0x3d   :  { %v1508_v4 = vld [vmem:[#allocation4 + $0x60] ss:$12 sps:$4 sm:$0xff]   ;;  %v1514_v5 = vld [vmem:[#allocation4 + $0x7c] ss:$12 sps:$4 sm:$0xff]   ;;  %v1524_v6 = vld [vmem:[#allocation4 + $0x38] ss:$12 sps:$4 sm:$0xff]  }
  0x3e   :  { %258 = vmatpush1.bf16.msra.mxu0 %v1451_v17  ;;  %v1512_v7 = vld [vmem:[#allocation4 + $0x78] ss:$12 sps:$4 sm:$0xff]   ;;  %v1518_v8 = vld [vmem:[#allocation4 + $0x94] ss:$12 sps:$4 sm:$0xff]   ;;  %v1525_v9 = vld [vmem:[#allocation4 + $0x50] ss:$12 sps:$4 sm:$0xff]  }
  0x3f   :  { %259 = vmatprep.subr.bf16.mxu0 %v1452_v18  ;;  %1338 = vmatpush3.bf16.msra.mxu1 %v1475_v26  ;;  %v1516_v10 = vld [vmem:[#allocation4 + $0x90] ss:$12 sps:$4 sm:$0xff]   ;;  %v1522_v11 = vld [vmem:[#allocation4 + $0xac] ss:$12 sps:$4 sm:$0xff]   ;;  %v1526_v12 = vld [vmem:[#allocation4 + $0x68] ss:$12 sps:$4 sm:$0xff]  }
  0x40   :  { %1339 = vmatprep.subr.bf16.mxu1 %v1682_v0  ;;  %v1520_v13 = vld [vmem:[#allocation4 + $0xa8] ss:$12 sps:$4 sm:$0xff]   ;;  %v1527_v14 = vld [vmem:[#allocation4 + $0x80] ss:$12 sps:$4 sm:$0xff]   ;;  %v1528_v16 = vld [vmem:[#allocation4 + $0x98] ss:$12 sps:$4 sm:$0xff]  }
  0x41   :  { %v591_v15 = vld [vmem:[%s590_s12] sm:$0x1]  ;;  %v1529_v17 = vld [vmem:[#allocation4 + $0xb0] ss:$12 sps:$4 sm:$0xff]   ;;  %v1541_v26 = vld [vmem:[#allocation4 + $0xf8] ss:$12 sps:$4 sm:$0xff]  }
  0x42   :  { %260 = vmatpush1.bf16.msra.mxu0 %v1454_v20  ;;  %v1532_v18 = vld [vmem:[#allocation4 + $0xc4] ss:$12 sps:$4 sm:$0xff]   ;;  %v1530_v19 = vld [vmem:[#allocation4 + $0xc0] ss:$12 sps:$4 sm:$0xff]   ;;  %v1533_v20 = vld [vmem:[#allocation4 + $0xc8] ss:$12 sps:$4 sm:$0xff]  }
  0x43   :  { %261 = vmatprep.subr.bf16.mxu0 %v1456_v21  ;;  %1340 = vmatpush3.bf16.msra.mxu1 %v1479_v30  ;;  %v1534_v21 = vld [vmem:[#allocation4 + $0xd8] ss:$12 sps:$4 sm:$0xff]   ;;  %v1536_v22 = vld [vmem:[#allocation4 + $0xdc] ss:$12 sps:$4 sm:$0xff]   ;;  %s1171_s20 = sshll.u32 %s1686_s19, 4  ;;  %s1836_s20 = int_to_ptr.vmem [resolvable:$true] %s1171_s20 }
  0x44   :  { %1341 = vmatprep.subr.bf16.mxu1 %v1682_v0  ;;  %v1548_v30 = vld [vmem:[#allocation4 + $0x124] ss:$12 sps:$4 sm:$0xff]  }
  0x46   :  { %262 = vmatpush1.bf16.msra.mxu0 %v1458_v23  ;;  %v1540_v23 = vld [vmem:[#allocation4 + $0xf4] ss:$12 sps:$4 sm:$0xff]  }
  0x47   :  { %508 = vmatprep.subr.bf16.mxu0 %v1462_v25  ;;  %1342 = vmatpush3.bf16.msra.mxu1 %v1483_v33  ;;  %v1538_v25 = vld [vmem:[#allocation4 + $0xf0] ss:$12 sps:$4 sm:$0xff]  }
  0x48   :  { %1347 = vmatprep.subr.bf16.mxu1 %v1682_v0  ;;  %v1552_v33 = vld [vmem:[#allocation4 + $0x13c] ss:$12 sps:$4 sm:$0xff]  }
  0x49   :  { %280 = vmatmul.mubr.bf16.vlgmr.msra.gmra.mrb[0].mxu0 %v69_v28 }
  0x4a   :  { %509 = vmatpush1.bf16.msra.mxu0 %v1460_v27  ;;  %540 = vmatprep.mubr.bf16.mxu0 %v1683_v1  ;;  %v1544_v27 = vld [vmem:[#allocation4 + $0x10c] ss:$12 sps:$4 sm:$0xff]  }
  0x4b   :  { %510 = vmatprep.subr.bf16.mxu0 %v1466_v29  ;;  %1344 = vmatmul.mubr.bf16.vlgmr.msra.gmra.mrb[0].mxu1 %v69_v28  ;;  %v1542_v28 = vld [vmem:[#allocation4 + $0x108] ss:$12 sps:$4 sm:$0xff]   ;;  %v1545_v29 = vld [vmem:[#allocation4 + $0x110] ss:$12 sps:$4 sm:$0xff]  }
  0x4c   :  { %1348 = vmatpush3.bf16.msra.mxu1 %v1487_v36  ;;  %1363 = vmatprep.mubr.msk.bf16.mxu1 %vm1684_vm0, %v1682_v0  ;;  %v1556_v36 = vld [vmem:[#allocation4 + $0x154] ss:$12 sps:$4 sm:$0xff]  }
  0x4d   :  { %1349 = vmatprep.subr.bf16.mxu1 %v1682_v0 }
  0x4e   :  { %511 = vmatpush1.bf16.msra.mxu0 %v1464_v31  ;;  %v1546_v31 = vld [vmem:[#allocation4 + $0x120] ss:$12 sps:$4 sm:$0xff]  }
  0x4f   :  { %512 = vmatprep.subr.bf16.mxu0 %v1470_v32  ;;  %v1549_v32 = vld [vmem:[#allocation4 + $0x128] ss:$12 sps:$4 sm:$0xff]  }
  0x50   :  { %1350 = vmatpush3.bf16.msra.mxu1 %v1491_v39  ;;  %v1560_v39 = vld [vmem:[#allocation4 + $0x16c] ss:$12 sps:$4 sm:$0xff]  }
  0x51   :  { %1351 = vmatprep.subr.bf16.mxu1 %v1682_v0 }
  0x52   :  { %513 = vmatpush1.bf16.msra.mxu0 %v1468_v34  ;;  %v1550_v34 = vld [vmem:[#allocation4 + $0x138] ss:$12 sps:$4 sm:$0xff]  }
  0x53   :  { %514 = vmatprep.subr.bf16.mxu0 %v1474_v35  ;;  %v1553_v35 = vld [vmem:[#allocation4 + $0x140] ss:$12 sps:$4 sm:$0xff]  }
  0x54   :  { %1352 = vmatpush3.bf16.msra.mxu1 %v1495_v42 }
  0x55   :  { %1353 = vmatprep.subr.bf16.mxu1 %v1682_v0 }
  0x56   :  { %515 = vmatpush1.bf16.msra.mxu0 %v1472_v37  ;;  %v1554_v37 = vld [vmem:[#allocation4 + $0x150] ss:$12 sps:$4 sm:$0xff]  }
  0x57   :  { %516 = vmatprep.subr.bf16.mxu0 %v1478_v38  ;;  %v1557_v38 = vld [vmem:[#allocation4 + $0x158] ss:$12 sps:$4 sm:$0xff]  }
  0x58   :  { %1354 = vmatpush3.bf16.msra.mxu1 %v1499_v45 }
  0x59   :  { %1355 = vmatprep.subr.bf16.mxu1 %v1682_v0 }
  0x5a   :  { %517 = vmatpush1.bf16.msra.mxu0 %v1476_v40  ;;  %v1558_v40 = vld [vmem:[#allocation4 + $0x168] ss:$12 sps:$4 sm:$0xff]  }
  0x5b   :  { %518 = vmatprep.subr.bf16.mxu0 %v1482_v41  ;;  %v1561_v41 = vld [vmem:[#allocation4 + $0x170] ss:$12 sps:$4 sm:$0xff]  }
  0x5c   :  { %1356 = vmatpush3.bf16.msra.mxu1 %v1503_v48 }
  0x5d   :  { %1357 = vmatprep.subr.bf16.mxu1 %v1682_v0 }
  0x5e   :  { %519 = vmatpush1.bf16.msra.mxu0 %v1480_v43 }
  0x5f   :  { %520 = vmatprep.subr.bf16.mxu0 %v1486_v44 }
  0x60   :  { %1358 = vmatpush3.bf16.msra.mxu1 %v1507_v52 }
  0x61   :  { %1359 = vmatprep.subr.bf16.mxu1 %v1682_v0 }
  0x62   :  { %521 = vmatpush1.bf16.msra.mxu0 %v1484_v46 }
  0x63   :  { %522 = vmatprep.subr.bf16.mxu0 %v1490_v47 }
  0x64   :  { %1360 = vmatpush3.bf16.msra.mxu1 %v1511_v56 }
  0x65   :  { %1361 = vmatprep.subr.bf16.mxu1 %v1682_v0 }
  0x66   :  { %523 = vmatpush1.bf16.msra.mxu0 %v1488_v49 }
  0x67   :  { %769 = vmatprep.subr.bf16.mxu0 %v1494_v51  ;;  %v232_v51 = vlaneseq }
  0x68   :  { %1362 = vmatpush3.bf16.msra.mxu1 %v1515_v59 }
  0x69   :  { %541 = vmatmul.mubr.bf16.vlgmr.msra.gmra.mrb[4].mxu0 %v328_v54  ;;  %1367 = vmatprep.subr.bf16.mxu1 %v1682_v0  ;;  %v233_v52 = vshrl.u32 %v232_v51, 7 }
  0x6a   :  { %770 = vmatpush1.bf16.msra.mxu0 %v1492_v53  ;;  %801 = vmatprep.mubr.bf16.mxu0 %v1683_v1 }
  0x6b   :  { %771 = vmatprep.subr.bf16.mxu0 %v1498_v55  ;;  %1364 = vmatmul.mubr.bf16.vlgmr.msra.gmra.mrb[4].mxu1 %v328_v54  ;;  %v234_v53 = vsub.s32 0, %v233_v52  ;;  %v624_v54 = vld [vmem:[%s1872_s5] sm:$0x7]  ;;  %v238_v55 = vsub.s32 1, %v233_v52 }
  0x6c   :  { %1368 = vmatpush3.bf16.msra.mxu1 %v1519_v62  ;;  %1383 = vmatprep.mubr.msk.bf16.mxu1 %vm1684_vm0, %v1682_v0 }
  0x6d   :  { %1369 = vmatprep.subr.bf16.mxu1 %v1682_v0  ;;  %v761_v59 = vrot.slane %v624_v54, %v238_v55 }
  0x6e   :  { %772 = vmatpush1.bf16.msra.mxu0 %v1496_v57  ;;  %v757_v57 = vrot.slane %v624_v54, %v234_v53 }
  0x6f   :  { %773 = vmatprep.subr.bf16.mxu0 %v1502_v58 }
  0x70   :  { %1370 = vmatpush3.bf16.msra.mxu1 %v1523_v3 }
  0x71   :  { %1371 = vmatprep.subr.bf16.mxu1 %v1682_v0 }
  0x72   :  { %774 = vmatpush1.bf16.msra.mxu0 %v1500_v60 }
  0x73   :  { %775 = vmatprep.subr.bf16.mxu0 %v1506_v61 }
  0x74   :  { %1372 = vmatpush3.bf16.msra.mxu1 %v1524_v6 }
  0x75   :  { %1373 = vmatprep.subr.bf16.mxu1 %v1682_v0 }
  0x76   :  { %776 = vmatpush1.bf16.msra.mxu0 %v1504_v63 }
  0x77   :  { %777 = vmatprep.subr.bf16.mxu0 %v1510_v2 }
  0x78   :  { %1374 = vmatpush3.bf16.msra.mxu1 %v1525_v9 }
  0x79   :  { %1375 = vmatprep.subr.bf16.mxu1 %v1682_v0 }
  0x7a   :  { %778 = vmatpush1.bf16.msra.mxu0 %v1508_v4 }
  0x7b   :  { %779 = vmatprep.subr.bf16.mxu0 %v1514_v5 }
  0x7c   :  { %1376 = vmatpush3.bf16.msra.mxu1 %v1526_v12 }
  0x7d   :  { %1377 = vmatprep.subr.bf16.mxu1 %v1682_v0 }
  0x7e   :  { %780 = vmatpush1.bf16.msra.mxu0 %v1512_v7 }
  0x7f   :  { %781 = vmatprep.subr.bf16.mxu0 %v1518_v8 }
  0x80   :  { %1378 = vmatpush3.bf16.msra.mxu1 %v1527_v14  ;;  %v242_v14 = vsub.s32 2, %v233_v52 }
  0x81   :  { %1379 = vmatprep.subr.bf16.mxu1 %v1682_v0 }
  0x82   :  { %782 = vmatpush1.bf16.msra.mxu0 %v1516_v10 }
  0x83   :  { %783 = vmatprep.subr.bf16.mxu0 %v1522_v11 }
  0x84   :  { %1380 = vmatpush3.bf16.msra.mxu1 %v1528_v16 }
  0x85   :  { %1381 = vmatprep.subr.bf16.mxu1 %v1682_v0 }
  0x86   :  { %784 = vmatpush1.bf16.msra.mxu0 %v1520_v13 }
  0x87   :  { %1052 = vmatprep.subr.bf16.mxu0 %v1532_v18 }
  0x88   :  { %1382 = vmatpush3.bf16.msra.mxu1 %v1529_v17  ;;  %v765_v17 = vrot.slane %v624_v54, %v242_v14 }
  0x89   :  { %802 = vmatmul.mubr.bf16.vlgmr.msra.gmra.mrb[0].mxu0 %v591_v15  ;;  %1387 = vmatprep.subr.bf16.mxu1 %v1682_v0 }
  0x8a   :  { %1084 = vmatprep.mubr.bf16.mxu0 %v1683_v1  ;;  %1053 = vmatpush1.bf16.msra.mxu0 %v1530_v19  ;;  %v1537_v1 = vld [vmem:[#allocation4 + $0xe0] ss:$12 sps:$4 sm:$0xff]  }
  0x8b   :  { %1384 = vmatmul.mubr.bf16.vlgmr.msra.gmra.mrb[8].mxu1 %v591_v15  ;;  %1054 = vmatprep.subr.bf16.mxu0 %v1536_v22 }
  0x8c   :  { %1403 = vmatprep.mubr.msk.bf16.mxu1 %vm1684_vm0, %v1682_v0  ;;  %1388 = vmatpush3.bf16.msra.mxu1 %v1533_v20 }
  0x8d   :  { %1389 = vmatprep.subr.bf16.mxu1 %v1682_v0 }
  0x8e   :  { %1055 = vmatpush1.bf16.msra.mxu0 %v1534_v21 }
  0x8f   :  { %1056 = vmatprep.subr.bf16.mxu0 %v1540_v23 }
  0x90   :  { %1390 = vmatpush3.bf16.msra.mxu1 %v1537_v1 }
  0x91   :  { %1391 = vmatprep.subr.bf16.mxu1 %v1682_v0 }
  0x92   :  { %1057 = vmatpush1.bf16.msra.mxu0 %v1538_v25 }
  0x93   :  { %1058 = vmatprep.subr.bf16.mxu0 %v1544_v27 }
  0x94   :  { %1392 = vmatpush3.bf16.msra.mxu1 %v1541_v26 }
  0x95   :  { %1393 = vmatprep.subr.bf16.mxu1 %v1682_v0 }
  0x96   :  { %1059 = vmatpush1.bf16.msra.mxu0 %v1542_v28 }
  0x97   :  { %1060 = vmatprep.subr.bf16.mxu0 %v1548_v30 }
  0x98   :  { %1394 = vmatpush3.bf16.msra.mxu1 %v1545_v29 }
  0x99   :  { %1395 = vmatprep.subr.bf16.mxu1 %v1682_v0 }
  0x9a   :  { %1061 = vmatpush1.bf16.msra.mxu0 %v1546_v31  ;;  %v1264_v31 = vld [vmem:[%s1872_s5 + $0x3] sm:$0x7]  ;;  %s1685_s5 = smov [#allocation9]  }
  0x9b   :  { %1062 = vmatprep.subr.bf16.mxu0 %v1552_v33 }
  0x9c   :  { %1396 = vmatpush3.bf16.msra.mxu1 %v1549_v32  ;;  %v1213_v32 = vld [vmem:[%s1873_s6 + $0x3] sm:$0x7] }
  0x9d   :  { %1397 = vmatprep.subr.bf16.mxu1 %v1682_v0  ;;  %v496_v33 = vrot.slane %v1213_v32, %v234_v53 }
  0x9e   :  { %1063 = vmatpush1.bf16.msra.mxu0 %v1550_v34  ;;  %v1040_v34 = vrot.slane %v1264_v31, %v234_v53 }
  0x9f   :  { %1064 = vmatprep.subr.bf16.mxu0 %v1556_v36  ;;  %v1044_v36 = vrot.slane %v1264_v31, %v238_v55 }
  0xa0   :  { %1398 = vmatpush3.bf16.msra.mxu1 %v1553_v35  ;;  %v500_v35 = vrot.slane %v1213_v32, %v238_v55 }
  0xa1   :  { %1399 = vmatprep.subr.bf16.mxu1 %v1682_v0 }
  0xa2   :  { %1065 = vmatpush1.bf16.msra.mxu0 %v1554_v37  ;;  %v1411_v37 = vadd.f32 %v1040_v34, %v496_v33 }
  0xa3   :  { %1066 = vmatprep.subr.bf16.mxu0 %v1560_v39  ;;  %v1413_v39 = vadd.f32 %v1044_v36, %v500_v35 }
  0xa4   :  { %1400 = vmatpush3.bf16.msra.mxu1 %v1557_v38 }
  0xa5   :  { %1401 = vmatprep.subr.bf16.mxu1 %v1682_v0  ;;  %v102_v0 = vld [vmem:[%s1873_s6] sm:$0x7]  ;;  %s1162_s6 = sshll.u32 %s1685_s5, 4  ;;  %s1163_s6 = int_to_ptr.vmem [resolvable:$true] %s1162_s6 }
  0xa6   :  { %1067 = vmatpush1.bf16.msra.mxu0 %v1558_v40  ;;  %v235_v56 = vrot.slane %v102_v0, %v234_v53  ;;  %v239_v58 = vrot.slane %v102_v0, %v238_v55  ;;  %v243_v16 = vrot.slane %v102_v0, %v242_v14  ;;  %v504_v0 = vrot.slane %v1213_v32, %v242_v14  ;;  %s1626_s21 = scalar_lea.vmem %s1163_s6, 16  ;;  %s1630_s22 = scalar_lea.vmem %s1163_s6, 32 }
  0xa7   :  { %v1048_v55 = vrot.slane %v1264_v31, %v242_v14  ;;  %p1627_p2 = scmp.ne.s32.totalorder %s1163_s6, %s1626_s21  ;;  %p1631_p3 = scmp.lt.s32.totalorder %s1163_s6, %s1163_s6 }
  0xa8   :  { %1402 = vmatpush3.bf16.msra.mxu1 %v1561_v41  ;;  %v1407_v60 = vadd.f32 %v757_v57, %v235_v56  ;;  %v1409_v62 = vadd.f32 %v761_v59, %v239_v58  ;;  %p1632_p4 = scmp.lt.s32.totalorder %s1630_s22, %s1626_s21 }
  0xaa   :  { %p1633_p5 = por %p1632_p4, %p1631_p3 }
  0xac   :  { %p1634_p6 = pnand %p1633_p5, %p1627_p2 }
 0x11e   :  { %v322_v42 = vpop.f32.mrb[0].mxu1 }
 0x11f   :  { %v1345_v43 = vpop.f32.mrb[1].mxu1  ;;  %v323_v19 = vadd.f32 %v322_v42, %v243_v16 }
 0x120   :  { %v325_v44 = vpop.f32.mrb[2].mxu1 }
 0x121   :  { %v1346_v45 = vpop.f32.mrb[3].mxu1 }
 0x13e   :  { %v1819_v46 = vpop.f32.mrb[4].mxu1 }
 0x13f   :  { %v1365_v47 = vpop.f32.mrb[5].mxu1  ;;  %v584_v57 = vadd.f32 %v1819_v46, %v504_v0 }
 0x140   :  { %v586_v48 = vpop.f32.mrb[6].mxu1 }
 0x141   :  { %v1366_v49 = vpop.f32.mrb[7].mxu1 }
 0x15c   :  { %v803_v61 = vpop.f32.mrb[0].mxu0 }
 0x15d   :  { %v1408_v63 = vadd.f32 %v1407_v60, %v803_v61  ;;  %v805_v2 = vpop.f32.mrb[1].mxu0 }
 0x15e   :  { %v807_v3 = vpop.f32.mrb[2].mxu0  ;;  %v1410_v6 = vadd.f32 %v1409_v62, %v805_v2  ;;  %v844_v8 = vpop.f32.mrb[8].mxu1 }
 0x15f   :  { %v1262_v4 = vmul.f32 -1.442695, %v1408_v63  ;;  %v808_v5 = vpop.f32.mrb[3].mxu0  ;;  %v1385_v9 = vpop.f32.mrb[9].mxu1  ;;  %v845_v20 = vadd.f32 %v844_v8, %v765_v17 }
 0x160   :  { %v1263_v7 = vmul.f32 -1.442695, %v1410_v6  ;;  %v847_v10 = vpop.f32.mrb[10].mxu1 }
 0x161   :  { %1562 = vpow2.f32 %v1262_v4  ;;  %v1386_v11 = vpop.f32.mrb[11].mxu1 }
 0x162   :  { %1564 = vpow2.f32 %v1263_v7 }
 0x16b   :  { %v1563_v12 = vpop.eup %1562 }
 0x16c   :  { %v854_v13 = vadd.f32 1.0, %v1563_v12  ;;  %v1565_v15 = vpop.eup %1564 }
 0x16d   :  { %v861_v18 = vadd.f32 1.0, %v1565_v15 }
 0x16e   :  { %1566 = vrcp.f32 %v854_v13 }
 0x16f   :  { %1568 = vrcp.f32 %v861_v18 }
 0x178   :  { %v1567_v21 = vpop.eup %1566 }
 0x179   :  { %v864_v22 = vmul.f32 %v1567_v21, %v323_v19  ;;  %v1569_v23 = vpop.eup %1568 }
 0x17a   :  { %v867_v25 = vsub.f32 1.0, %v1569_v23  ;;  %v869_v28 = vmul.f32 %v1569_v23, %v1769_v24 }
 0x17b   :  { %v865_v1 = vadd.f32 %v864_v22, %v845_v20 }
 0x17d   :  { %1570 = vtanh.f32 %v865_v1 }
 0x187   :  { %v1571_v26 = vpop.eup %1570 }
 0x188   :  { %v868_v27 = vmul.f32 %v1571_v26, %v867_v25 }
 0x18a   :  { %v870_v29 = vadd.f32 %v869_v28, %v868_v27 }
 0x18c   :  { %v872_v30 = vpack.c.bf16 %v870_v29, %v870_v29  ;;  %871 = vst [vmem:[#allocation10] sm:$0x1] %v870_v29 }
 0x18e   :  { %1085 = vmatmul.mubr.bf16.vlgmr.msra.gmra.mrb[4].mxu0 %v872_v30  ;;  %1404 = vmatmul.mubr.bf16.vlgmr.msra.gmra.mrb[12].mxu1 %v872_v30 }
 0x261   :  { %v1086_v38 = vpop.f32.mrb[4].mxu0  ;;  %v1127_v24 = vpop.f32.mrb[12].mxu1 }
 0x262   :  { %v1412_v40 = vadd.f32 %v1411_v37, %v1086_v38  ;;  %v1088_v41 = vpop.f32.mrb[5].mxu0  ;;  %v1405_v42 = vpop.f32.mrb[13].mxu1  ;;  %v1128_v59 = vadd.f32 %v1127_v24, %v1048_v55 }
 0x263   :  { %v1090_v43 = vpop.f32.mrb[6].mxu0  ;;  %v1130_v44 = vpop.f32.mrb[14].mxu1  ;;  %v1414_v49 = vadd.f32 %v1413_v39, %v1088_v41 }
 0x264   :  { %v1289_v45 = vmul.f32 -1.442695, %v1412_v40  ;;  %v1091_v47 = vpop.f32.mrb[7].mxu0  ;;  %v1406_v48 = vpop.f32.mrb[15].mxu1 }
 0x265   :  { %v1290_v51 = vmul.f32 -1.442695, %v1414_v49 }
 0x266   :  { %1572 = vpow2.f32 %v1289_v45 }
 0x267   :  { %1574 = vpow2.f32 %v1290_v51 }
 0x270   :  { %v1573_v52 = vpop.eup %1572 }
 0x271   :  { %v1137_v53 = vadd.f32 1.0, %v1573_v52  ;;  %v1575_v54 = vpop.eup %1574 }
 0x272   :  { %v1144_v56 = vadd.f32 1.0, %v1575_v54 }
 0x273   :  { %1576 = vrcp.f32 %v1137_v53 }
 0x274   :  { %1578 = vrcp.f32 %v1144_v56 }
 0x27d   :  { %v1577_v58 = vpop.eup %1576 }
 0x27e   :  { %v1147_v60 = vmul.f32 %v1577_v58, %v584_v57  ;;  %v1579_v62 = vpop.eup %1578 }
 0x27f   :  { %v1150_v63 = vsub.f32 1.0, %v1579_v62  ;;  %v1152_v4 = vmul.f32 %v1579_v62, %v1783_v50 }
 0x280   :  { %v1148_v61 = vadd.f32 %v1147_v60, %v1128_v59 }
 0x282   :  { %1580 = vtanh.f32 %v1148_v61 }
 0x28c   :  { %v1581_v2 = vpop.eup %1580 }
 0x28d   :  { %v1151_v3 = vmul.f32 %v1581_v2, %v1150_v63 }
 0x28f   :  { %v1153_v5 = vadd.f32 %v1152_v4, %v1151_v3 }
 0x291   :  { %1155 = vst [vmem:[#allocation9] sm:$0x1] %v1153_v5  ;;  %1154 = vst [vmem:[#allocation10 + $0x1] sm:$0x1] %v1153_v5 }
 0x292   :  { %1637 = shalt.err (!%p1634_p6)
}
 0x293   :  { %s1638_s25 = scalar_lea.hbm %s1874_s7, 16 }
 0x294   :  { %p1639_p7 = scmp.ne.s32.totalorder %s1874_s7, %s1638_s25  ;;  %p1642_p8 = scmp.lt.u32.totalorder %s1638_s25, %s1874_s7 }
 0x296   :  { %p1644_p9 = pnand %p1642_p8, %p1639_p7 }
 0x298   :  { %1647 = shalt.err (!%p1644_p9)
}
 0x299   :  { %1165 = dma.vmem_to_hbm [thread:$0]  %s1163_s6, 16, %s1874_s7, [#allocation6]  }
 0x29a   :  { %s1648_s30 = scalar_lea.vmem %s1836_s20, 32  ;;  %p1653_p11 = scmp.lt.s32.totalorder %s1836_s20, %s1836_s20 }
 0x29b   :  { %p1649_p10 = scmp.ne.s32.totalorder %s1836_s20, %s1648_s30  ;;  %p1654_p12 = scmp.lt.s32.totalorder %s1648_s30, %s1648_s30 }
 0x29d   :  { %p1655_p13 = por %p1654_p12, %p1653_p11 }
 0x29f   :  { %p1656_p0 = pnand %p1655_p13, %p1649_p10 }
 0x2a1   :  { %1659 = shalt.err (!%p1656_p0)
}
 0x2a2   :  { %s1660_s10 = scalar_lea.hbm %s1875_s8, 32 }
 0x2a3   :  { %p1661_p1 = scmp.ne.s32.totalorder %s1875_s8, %s1660_s10  ;;  %p1664_p2 = scmp.lt.u32.totalorder %s1660_s10, %s1875_s8 }
 0x2a5   :  { %p1666_p3 = pnand %p1664_p2, %p1661_p1 }
 0x2a7   :  { %1669 = shalt.err (!%p1666_p3)
}
 0x2a8   :  { %s1687_s7 = smov 16   ;;  %s1688_s13 = smov 1  }
 0x2a9   :  { %1177 = dma.vmem_to_hbm [thread:$0]  %s1836_s20, 32, %s1875_s8, [#allocation11], %s1687_s7, %s1687_s7, %s1688_s13  }
 0x2aa   :  { %1674 = dma.done.wait [#allocation6], 16  }
 0x2ab   :  { %1675 = vsyncadd [#allocation6], 4294967280 }
 0x2ac   :  { %1676 = dma.done.wait [#allocation11], 32  }
 0x2ad   :  { %1677 = vsyncadd [#allocation11], 4294967264 }
 0x2ae   :  { %1184 = vsyncpa [#allocation5], 1 }
 0x2af   :  { %1185 = vsyncpa [#allocation8], 1 }
 0x2b0   :  { %1186 = vsyncpa [#allocation6], 1 }
 0x2b1   :  { %1187 = vsyncpa [#allocation11], 1 }

</bundles_post_ra>
